<compile_context>
chip_gen: v6e
topology: v6e:2x2x1
jax: 0.10.0
libtpu: 0.0.40
codegen_flags: <defaults>
</compile_context>

<pallas_src>
import functools

import jax
import jax.numpy as jnp
import numpy as np
from jax import lax
from jax.experimental import pallas as pl
from jax.experimental.pallas import tpu as pltpu


# ----------------------------------------------------------------------------
# Kernel 1: patch projection (W @ P) fused with BN statistics accumulation.
#   p_ref:   (1, K, tsp)   bf16 im2col columns for one batch image / one tile
#   w_ref:   (E, K)        bf16 flattened conv weight
#   y_ref:   (1, E, tsp)   bf16 projection output (lane-dense)
#   sum_ref: (1, E, 128)   f32  per-batch partial sums  (resident accumulator)
#   sq_ref:  (1, E, 128)   f32  per-batch partial sums of squares
# ----------------------------------------------------------------------------
def _proj_stats_kernel(p_ref, w_ref, y_ref, sum_ref, sq_ref):
    s = pl.program_id(1)

    y = jnp.dot(w_ref[...], p_ref[0],
                preferred_element_type=jnp.float32)        # (E, tsp) f32
    y_ref[0] = y.astype(y_ref.dtype)

    # Fold tsp lanes down to 128-lane partial sums with lane-aligned slices
    # (cheap vreg selection; defers the cross-lane reduction to JAX epilogue).
    tsp = y.shape[1]
    ps = y[:, :128]
    pq = ps * ps
    for j in range(1, tsp // 128):
        blk = y[:, j * 128:(j + 1) * 128]
        ps = ps + blk
        pq = pq + blk * blk

    @pl.when(s == 0)
    def _():
        sum_ref[...] = jnp.zeros_like(sum_ref)
        sq_ref[...] = jnp.zeros_like(sq_ref)

    sum_ref[0] += ps
    sq_ref[0] += pq


# ----------------------------------------------------------------------------
# Kernel 2: BN normalize + affine: out = y * scale + shift   (per channel E)
# ----------------------------------------------------------------------------
def _bn_kernel(y_ref, scale_ref, shift_ref, o_ref):
    o_ref[0] = y_ref[0].astype(jnp.float32) * scale_ref[0] + shift_ref[0]


def _im2col_nk_sp(x, patch_size, stride, padding):
    """x: (N, C, H, W) -> patches (N, C*ph*pw, Ho*Wo) (K order = (c, kh, kw))."""
    n, c, h, w = x.shape
    ph, pw = patch_size
    sh, sw = stride
    pad_h, pad_w = padding
    x_pad = jnp.pad(x, ((0, 0), (0, 0), (pad_h, pad_h), (pad_w, pad_w)))
    ho = (h + 2 * pad_h - ph) // sh + 1
    wo = (w + 2 * pad_w - pw) // sw + 1
    taps = []
    for kh in range(ph):
        for kw in range(pw):
            taps.append(x_pad[:, :, kh:kh + sh * ho:sh, kw:kw + sw * wo:sw])
    p = jnp.stack(taps, axis=2)                    # (N, C, ph*pw, Ho, Wo)
    p = p.reshape(n, c * ph * pw, ho * wo)         # (N, K, Sp)
    return p, ho, wo


@functools.partial(jax.jit,
                   static_argnames=("patch_size", "stride", "padding", "tile_sp"))
def patch_embed_overlapping(x, weight, bias, gamma, beta,
                            patch_size=(4, 4), stride=(2, 2), padding=(1, 1),
                            eps=1e-5, tile_sp=512):
    """Forward pass of PatchEmbedOverlapping (Conv2d + BatchNorm2d, training mode).

    `bias` is accepted for interface parity but is mathematically cancelled by
    the training-mode BatchNorm that follows the convolution.
    """
    del bias  # cancelled by BN (mean shifts by exactly the bias)

    n, c, _, _ = x.shape
    ph, pw = patch_size
    e = weight.shape[0]
    k = c * ph * pw

    # ---- im2col in bf16, spatial axis last (lanes) ----
    patches, ho, wo = _im2col_nk_sp(x.astype(jnp.bfloat16), patch_size, stride,
                                    padding)
    sp = ho * wo
    m_true = n * sp

    # Spatial tile: multiple of 128 lanes, up to tile_sp.
    sp128 = ((sp + 127) // 128) * 128
    tsp = min(((tile_sp + 127) // 128) * 128, sp128)
    sp_pad = ((sp + tsp - 1) // tsp) * tsp
    if sp_pad != sp:
        # Zero columns -> zero conv output (no bias) -> contribute 0 to BN stats.
        patches = jnp.pad(patches, ((0, 0), (0, 0), (0, sp_pad - sp)))
    n_sp = sp_pad // tsp

    w2 = weight.reshape(e, k).astype(jnp.bfloat16)          # (E, K)

    # ---- kernel 1: projection + BN statistics ----
    flops1 = 2 * n * e * k * sp_pad + 3 * n * e * sp_pad
    bytes1 = (n * k * sp_pad * 2 + e * k * 2 + n * e * sp_pad * 2
              + 2 * n * e * 128 * 4)
    y, sums, sqs = pl.pallas_call(
        _proj_stats_kernel,
        out_shape=(
            jax.ShapeDtypeStruct((n, e, sp_pad), jnp.bfloat16),
            jax.ShapeDtypeStruct((n, e, 128), jnp.float32),
            jax.ShapeDtypeStruct((n, e, 128), jnp.float32),
        ),
        grid_spec=pltpu.PrefetchScalarGridSpec(
            num_scalar_prefetch=0,
            grid=(n, n_sp),
            in_specs=[
                pl.BlockSpec((1, k, tsp), lambda b, s: (b, 0, s)),
                pl.BlockSpec((e, k), lambda b, s: (0, 0)),
            ],
            out_specs=[
                pl.BlockSpec((1, e, tsp), lambda b, s: (b, 0, s)),
                pl.BlockSpec((1, e, 128), lambda b, s: (b, 0, 0)),  # accum over s
                pl.BlockSpec((1, e, 128), lambda b, s: (b, 0, 0)),  # accum over s
            ],
        ),
        compiler_params=pltpu.CompilerParams(
            dimension_semantics=("parallel", "arbitrary")),
        cost_estimate=pl.CostEstimate(flops=flops1, transcendentals=0,
                                      bytes_accessed=bytes1),
    )(patches, w2)

    # ---- BatchNorm2d (training mode) statistics over (N, Ho, Wo) ----
    total_sum = jnp.sum(sums, axis=(0, 2))                  # (E,)
    total_sq = jnp.sum(sqs, axis=(0, 2))                    # (E,)
    mean = total_sum / m_true
    var = total_sq / m_true - mean * mean                   # biased variance
    scale = gamma.astype(jnp.float32) * lax.rsqrt(var + eps)
    shift = beta.astype(jnp.float32) - mean * scale
    scale3 = scale.reshape(1, e, 1)
    shift3 = shift.reshape(1, e, 1)

    # ---- kernel 2: normalize + affine (lane-dense elementwise) ----
    flops2 = 2 * n * e * sp_pad
    bytes2 = n * e * sp_pad * (2 + 4) + 2 * e * 4
    out_pad = pl.pallas_call(
        _bn_kernel,
        out_shape=jax.ShapeDtypeStruct((n, e, sp_pad), jnp.float32),
        grid_spec=pltpu.PrefetchScalarGridSpec(
            num_scalar_prefetch=0,
            grid=(n, n_sp),
            in_specs=[
                pl.BlockSpec((1, e, tsp), lambda b, s: (b, 0, s)),
                pl.BlockSpec((1, e, 1), lambda b, s: (0, 0, 0)),
                pl.BlockSpec((1, e, 1), lambda b, s: (0, 0, 0)),
            ],
            out_specs=pl.BlockSpec((1, e, tsp), lambda b, s: (b, 0, s)),
        ),
        compiler_params=pltpu.CompilerParams(
            dimension_semantics=("parallel", "parallel")),
        cost_estimate=pl.CostEstimate(flops=flops2, transcendentals=0,
                                      bytes_accessed=bytes2),
    )(y, scale3, shift3)

    # ---- drop spatial padding; reshape straight to NCHW (no transpose) ----
    out = out_pad[:, :, :sp] if sp_pad != sp else out_pad
    return out.reshape(n, e, ho, wo)


def _reference(x, weight, bias, gamma, beta, stride, padding, eps=1e-5):
    """Pure-JAX f32 reference (conv + training-mode BN) for verification."""
    y = lax.conv_general_dilated(
        x.astype(jnp.float32), weight.astype(jnp.float32),
        window_strides=stride,
        padding=[(padding[0], padding[0]), (padding[1], padding[1])],
        dimension_numbers=("NCHW", "OIHW", "NCHW"),
    ) + bias.reshape(1, -1, 1, 1)
    mean = jnp.mean(y, axis=(0, 2, 3), keepdims=True)
    var = jnp.mean((y - mean) ** 2, axis=(0, 2, 3), keepdims=True)
    yn = (y - mean) * lax.rsqrt(var + eps)
    return yn * gamma.reshape(1, -1, 1, 1) + beta.reshape(1, -1, 1, 1)


if __name__ == "__main__":
    # Small config consistent with the module: overlapping patches.
    N, C, H, W = 2, 4, 16, 16
    PATCH, STRIDE, PAD = (4, 4), (2, 2), (1, 1)
    EMBED = 32

    key = jax.random.PRNGKey(0)
    kx, kw, kb, kg, kbeta = jax.random.split(key, 5)
    x = jax.random.normal(kx, (N, C, H, W), dtype=jnp.float32)

    # Conv2d params: weight (E, C, ph, pw), bias (E,).
    fan_in = C * PATCH[0] * PATCH[1]
    bound = 1.0 / np.sqrt(fan_in)
    weight = jax.random.uniform(kw, (EMBED, C, PATCH[0], PATCH[1]),
                                minval=-bound, maxval=bound, dtype=jnp.float32)
    bias = jax.random.uniform(kb, (EMBED,), minval=-bound, maxval=bound,
                              dtype=jnp.float32)
    # Non-trivial BN affine to exercise gamma/beta.
    gamma = jax.random.uniform(kg, (EMBED,), minval=0.5, maxval=1.5,
                               dtype=jnp.float32)
    beta = 0.1 * jax.random.normal(kbeta, (EMBED,), dtype=jnp.float32)

    out = patch_embed_overlapping(x, weight, bias, gamma, beta,
                                  patch_size=PATCH, stride=STRIDE, padding=PAD)
    out = jax.block_until_ready(out)
    ref = _reference(x, weight, bias, gamma, beta, STRIDE, PAD)
    # bf16 MXU inputs + bf16 intermediate y -> compare at bf16-level tolerance.
    np.testing.assert_allclose(np.asarray(out), np.asarray(ref),
                               rtol=5e-2, atol=5e-2)

    # Second config: multiple spatial tiles + zero-padded tail tile, exercises
    # the cross-tile statistics accumulation and the padded-column path.
    x2 = jax.random.normal(jax.random.PRNGKey(1), (2, C, 24, 24),
                           dtype=jnp.float32)
    out2 = patch_embed_overlapping(x2, weight, bias, gamma, beta,
                                   patch_size=PATCH, stride=STRIDE, padding=PAD,
                                   tile_sp=128)
    out2 = jax.block_until_ready(out2)
    ref2 = _reference(x2, weight, bias, gamma, beta, STRIDE, PAD)
    np.testing.assert_allclose(np.asarray(out2), np.asarray(ref2),
                               rtol=5e-2, atol=5e-2)

    print("KERNEL_OK")
</pallas_src>

<mosaic_0001>
module attributes {stable_mosaic.version = 11 : i64} {
  func.func @_proj_stats_kernel(%arg0: i32, %arg1: i32, %arg2: memref<1x64x128xbf16, #tpu.memory_space<vmem>>, %arg3: memref<32x64xbf16, #tpu.memory_space<vmem>>, %arg4: memref<1x32x128xbf16, #tpu.memory_space<vmem>>, %arg5: memref<1x32x128xf32, #tpu.memory_space<vmem>>, %arg6: memref<1x32x128xf32, #tpu.memory_space<vmem>>) attributes {dimension_semantics = [#tpu.dimension_semantics<parallel>, #tpu.dimension_semantics<arbitrary>], iteration_bounds = array<i64: 2, 1>, scalar_prefetch = 0 : i64, scratch_operands = 0 : i64, tpu.core_type = #tpu.core_type<tc>, window_params = [{transform_indices = @transform_0, window_bounds = array<i64: 1, 64, 128>}, {pipeline_mode = #tpu.pipeline_mode<synchronous>, transform_indices = @transform_1, window_bounds = array<i64: 32, 64>}, {transform_indices = @transform_2, window_bounds = array<i64: 1, 32, 128>}, {transform_indices = @transform_3, window_bounds = array<i64: 1, 32, 128>}, {transform_indices = @transform_4, window_bounds = array<i64: 1, 32, 128>}]} {
    %c0 = arith.constant 0 : index
    %c0_0 = arith.constant 0 : index
    %0 = vector.load %arg3[%c0, %c0_0] : memref<32x64xbf16, #tpu.memory_space<vmem>>, vector<32x64xbf16>
    %c0_1 = arith.constant 0 : index
    %c0_2 = arith.constant 0 : index
    %c0_3 = arith.constant 0 : index
    %1 = vector.load %arg2[%c0_1, %c0_2, %c0_3] : memref<1x64x128xbf16, #tpu.memory_space<vmem>>, vector<1x64x128xbf16>
    %2 = vector.shape_cast %1 : vector<1x64x128xbf16> to vector<64x128xbf16>
    %cst = arith.constant dense<0.000000e+00> : vector<32x128xf32>
    %3 = tpu.matmul %0, %2, %cst {dimension_numbers = #tpu.dot_dimension_numbers<[1], [0], [0], [1], [0, 0, 1, 1], [], []>} : vector<32x64xbf16>, vector<64x128xbf16>, vector<32x128xf32> -> vector<32x128xf32>
    %4 = arith.truncf %3 : vector<32x128xf32> to vector<32x128xbf16>
    %c0_4 = arith.constant 0 : index
    %c0_5 = arith.constant 0 : index
    %c0_6 = arith.constant 0 : index
    %5 = vector.load %arg4[%c0_4, %c0_5, %c0_6] : memref<1x32x128xbf16, #tpu.memory_space<vmem>>, vector<1x32x128xbf16>
    %6 = vector.shape_cast %5 : vector<1x32x128xbf16> to vector<32x128xbf16>
    %7 = vector.shape_cast %4 : vector<32x128xbf16> to vector<1x32x128xbf16>
    tpu.vector_store %arg4[%c0_4, %c0_5, %c0_6], %7 {strides = array<i32>} : memref<1x32x128xbf16, #tpu.memory_space<vmem>>, vector<1x32x128xbf16>,
    %8 = arith.mulf %3, %3 : vector<32x128xf32>
    %c0_i32 = arith.constant 0 : i32
    %9 = arith.cmpi eq, %arg1, %c0_i32 : i32
    %10 = arith.extui %9 : i1 to i32
    %c0_i32_7 = arith.constant 0 : i32
    %11 = arith.cmpi ne, %10, %c0_i32_7 : i32
    scf.if %11 {
      %cst_20 = arith.constant 0.000000e+00 : f32
      %24 = vector.broadcast %cst_20 : f32 to vector<1x32x128xf32>
      %c0_21 = arith.constant 0 : index
      %c0_22 = arith.constant 0 : index
      %c0_23 = arith.constant 0 : index
      %25 = vector.load %arg5[%c0_21, %c0_22, %c0_23] : memref<1x32x128xf32, #tpu.memory_space<vmem>>, vector<1x32x128xf32>
      tpu.vector_store %arg5[%c0_21, %c0_22, %c0_23], %24 {strides = array<i32>} : memref<1x32x128xf32, #tpu.memory_space<vmem>>, vector<1x32x128xf32>,
      %cst_24 = arith.constant 0.000000e+00 : f32
      %26 = vector.broadcast %cst_24 : f32 to vector<1x32x128xf32>
      %c0_25 = arith.constant 0 : index
      %c0_26 = arith.constant 0 : index
      %c0_27 = arith.constant 0 : index
      %27 = vector.load %arg6[%c0_25, %c0_26, %c0_27] : memref<1x32x128xf32, #tpu.memory_space<vmem>>, vector<1x32x128xf32>
      tpu.vector_store %arg6[%c0_25, %c0_26, %c0_27], %26 {strides = array<i32>} : memref<1x32x128xf32, #tpu.memory_space<vmem>>, vector<1x32x128xf32>,
    } else {
    }
    %c0_8 = arith.constant 0 : index
    %c0_9 = arith.constant 0 : index
    %c0_10 = arith.constant 0 : index
    %12 = vector.load %arg5[%c0_8, %c0_9, %c0_10] : memref<1x32x128xf32, #tpu.memory_space<vmem>>, vector<1x32x128xf32>
    %13 = vector.shape_cast %12 : vector<1x32x128xf32> to vector<32x128xf32>
    %14 = arith.addf %13, %3 : vector<32x128xf32>
    %c0_11 = arith.constant 0 : index
    %c0_12 = arith.constant 0 : index
    %c0_13 = arith.constant 0 : index
    %15 = vector.load %arg5[%c0_11, %c0_12, %c0_13] : memref<1x32x128xf32, #tpu.memory_space<vmem>>, vector<1x32x128xf32>
    %16 = vector.shape_cast %15 : vector<1x32x128xf32> to vector<32x128xf32>
    %17 = vector.shape_cast %14 : vector<32x128xf32> to vector<1x32x128xf32>
    tpu.vector_store %arg5[%c0_11, %c0_12, %c0_13], %17 {strides = array<i32>} : memref<1x32x128xf32, #tpu.memory_space<vmem>>, vector<1x32x128xf32>,
    %c0_14 = arith.constant 0 : index
    %c0_15 = arith.constant 0 : index
    %c0_16 = arith.constant 0 : index
    %18 = vector.load %arg6[%c0_14, %c0_15, %c0_16] : memref<1x32x128xf32, #tpu.memory_space<vmem>>, vector<1x32x128xf32>
    %19 = vector.shape_cast %18 : vector<1x32x128xf32> to vector<32x128xf32>
    %20 = arith.addf %19, %8 : vector<32x128xf32>
    %c0_17 = arith.constant 0 : index
    %c0_18 = arith.constant 0 : index
    %c0_19 = arith.constant 0 : index
    %21 = vector.load %arg6[%c0_17, %c0_18, %c0_19] : memref<1x32x128xf32, #tpu.memory_space<vmem>>, vector<1x32x128xf32>
    %22 = vector.shape_cast %21 : vector<1x32x128xf32> to vector<32x128xf32>
    %23 = vector.shape_cast %20 : vector<32x128xf32> to vector<1x32x128xf32>
    tpu.vector_store %arg6[%c0_17, %c0_18, %c0_19], %23 {strides = array<i32>} : memref<1x32x128xf32, #tpu.memory_space<vmem>>, vector<1x32x128xf32>,
    return
  }
  func.func @transform_0(%arg0: i32, %arg1: i32) -> (i32, i32, i32) {
    %c0_i32 = arith.constant 0 : i32
    %c0_i32_0 = arith.constant 0 : i32
    return %arg0, %c0_i32, %arg1 : i32, i32, i32
  }
  func.func @transform_1(%arg0: i32, %arg1: i32) -> (i32, i32) {
    %c0_i32 = arith.constant 0 : i32
    %c0_i32_0 = arith.constant 0 : i32
    %c0_i32_1 = arith.constant 0 : i32
    return %c0_i32, %c0_i32_0 : i32, i32
  }
  func.func @transform_2(%arg0: i32, %arg1: i32) -> (i32, i32, i32) {
    %c0_i32 = arith.constant 0 : i32
    %c0_i32_0 = arith.constant 0 : i32
    return %arg0, %c0_i32, %arg1 : i32, i32, i32
  }
  func.func @transform_3(%arg0: i32, %arg1: i32) -> (i32, i32, i32) {
    %c0_i32 = arith.constant 0 : i32
    %c0_i32_0 = arith.constant 0 : i32
    %c0_i32_1 = arith.constant 0 : i32
    return %arg0, %c0_i32, %c0_i32_0 : i32, i32, i32
  }
  func.func @transform_4(%arg0: i32, %arg1: i32) -> (i32, i32, i32) {
    %c0_i32 = arith.constant 0 : i32
    %c0_i32_0 = arith.constant 0 : i32
    %c0_i32_1 = arith.constant 0 : i32
    return %arg0, %c0_i32, %c0_i32_0 : i32, i32, i32
  }
}

module attributes {stable_mosaic.version = 11 : i64} {
  func.func @_bn_kernel(%arg0: i32, %arg1: i32, %arg2: memref<1x32x128xbf16, #tpu.memory_space<vmem>>, %arg3: memref<1x32x1xf32, #tpu.memory_space<vmem>>, %arg4: memref<1x32x1xf32, #tpu.memory_space<vmem>>, %arg5: memref<1x32x128xf32, #tpu.memory_space<vmem>>) attributes {dimension_semantics = [#tpu.dimension_semantics<parallel>, #tpu.dimension_semantics<parallel>], iteration_bounds = array<i64: 2, 1>, scalar_prefetch = 0 : i64, scratch_operands = 0 : i64, tpu.core_type = #tpu.core_type<tc>, window_params = [{transform_indices = @transform_0, window_bounds = array<i64: 1, 32, 128>}, {pipeline_mode = #tpu.pipeline_mode<synchronous>, transform_indices = @transform_1, window_bounds = array<i64: 1, 32, 1>}, {pipeline_mode = #tpu.pipeline_mode<synchronous>, transform_indices = @transform_2, window_bounds = array<i64: 1, 32, 1>}, {transform_indices = @transform_3, window_bounds = array<i64: 1, 32, 128>}]} {
    %c0 = arith.constant 0 : index
    %c0_0 = arith.constant 0 : index
    %c0_1 = arith.constant 0 : index
    %0 = vector.load %arg2[%c0, %c0_0, %c0_1] : memref<1x32x128xbf16, #tpu.memory_space<vmem>>, vector<1x32x128xbf16>
    %1 = vector.shape_cast %0 : vector<1x32x128xbf16> to vector<32x128xbf16>
    %2 = arith.extf %1 : vector<32x128xbf16> to vector<32x128xf32>
    %c0_2 = arith.constant 0 : index
    %c0_3 = arith.constant 0 : index
    %c0_4 = arith.constant 0 : index
    %3 = vector.load %arg3[%c0_2, %c0_3, %c0_4] : memref<1x32x1xf32, #tpu.memory_space<vmem>>, vector<1x32x1xf32>
    %4 = vector.shape_cast %3 : vector<1x32x1xf32> to vector<32x1xf32>
    %5 = vector.broadcast %4 : vector<32x1xf32> to vector<32x128xf32>
    %6 = arith.mulf %2, %5 : vector<32x128xf32>
    %c0_5 = arith.constant 0 : index
    %c0_6 = arith.constant 0 : index
    %c0_7 = arith.constant 0 : index
    %7 = vector.load %arg4[%c0_5, %c0_6, %c0_7] : memref<1x32x1xf32, #tpu.memory_space<vmem>>, vector<1x32x1xf32>
    %8 = vector.shape_cast %7 : vector<1x32x1xf32> to vector<32x1xf32>
    %9 = vector.broadcast %8 : vector<32x1xf32> to vector<32x128xf32>
    %10 = arith.addf %6, %9 : vector<32x128xf32>
    %c0_8 = arith.constant 0 : index
    %c0_9 = arith.constant 0 : index
    %c0_10 = arith.constant 0 : index
    %11 = vector.load %arg5[%c0_8, %c0_9, %c0_10] : memref<1x32x128xf32, #tpu.memory_space<vmem>>, vector<1x32x128xf32>
    %12 = vector.shape_cast %11 : vector<1x32x128xf32> to vector<32x128xf32>
    %13 = vector.shape_cast %10 : vector<32x128xf32> to vector<1x32x128xf32>
    tpu.vector_store %arg5[%c0_8, %c0_9, %c0_10], %13 {strides = array<i32>} : memref<1x32x128xf32, #tpu.memory_space<vmem>>, vector<1x32x128xf32>,
    return
  }
  func.func @transform_0(%arg0: i32, %arg1: i32) -> (i32, i32, i32) {
    %c0_i32 = arith.constant 0 : i32
    %c0_i32_0 = arith.constant 0 : i32
    return %arg0, %c0_i32, %arg1 : i32, i32, i32
  }
  func.func @transform_1(%arg0: i32, %arg1: i32) -> (i32, i32, i32) {
    %c0_i32 = arith.constant 0 : i32
    %c0_i32_0 = arith.constant 0 : i32
    %c0_i32_1 = arith.constant 0 : i32
    %c0_i32_2 = arith.constant 0 : i32
    return %c0_i32, %c0_i32_0, %c0_i32_1 : i32, i32, i32
  }
  func.func @transform_2(%arg0: i32, %arg1: i32) -> (i32, i32, i32) {
    %c0_i32 = arith.constant 0 : i32
    %c0_i32_0 = arith.constant 0 : i32
    %c0_i32_1 = arith.constant 0 : i32
    %c0_i32_2 = arith.constant 0 : i32
    return %c0_i32, %c0_i32_0, %c0_i32_1 : i32, i32, i32
  }
  func.func @transform_3(%arg0: i32, %arg1: i32) -> (i32, i32, i32) {
    %c0_i32 = arith.constant 0 : i32
    %c0_i32_0 = arith.constant 0 : i32
    return %arg0, %c0_i32, %arg1 : i32, i32, i32
  }
}

</mosaic_0001>

<bundles_post_ra>
// kernel: patch_embed_overlapping.3
= control target key start
LH: loop header
LB: loop body
LE: loop exit
PB: predicated region body
PF: predicated region fallthrough
CT: control target
= control target key end

     0   :  { %s447_s12 = smov 0   ;;  %s449_s13 = smov 0   ;;  %s508_s0 = inlined_call_operand.vmem [shape: bf16[2,32,128], index: 0, kind: input, shape index: {}]   ;;  %s509_s1 = inlined_call_operand.vmem [shape: f32[1,32,1], index: 1, kind: input, shape index: {}]   ;;  %s510_s2 = inlined_call_operand.vmem [shape: f32[1,32,1], index: 2, kind: input, shape index: {}]   ;;  %s511_s3 = inlined_call_operand.vmem [shape: f32[2,32,128], index: 3, kind: output, shape index: {}]  }
   0x1   :  { %s451_s14 = smov 0  }
   0x2 LB: > { %s25_s15 = sadd.s32 1, %s420_s13  ;;  %p357_p0 = scmp.ge.s32.totalorder %s424_s14, 1  ;;  %s424_s14 = sphi %s451_s14, %s13_s14   ;;  %s420_s13 = sphi %s449_s13, %s513_s13   ;;  %s416_s12 = sphi %s447_s12, %s512_s12  }
   0x3   : > { %p27_p1 = scmp.ge.s32.totalorder %s25_s15, 2  ;;  %p156_p2 = scmp.lt.s32.totalorder %s424_s14, 3 }
   0x5   : > { %s515_s15 = smov (%p27_p1, %s25_s15), 0  ;;  %p157_p3 = pnand %p357_p0, %p156_p2 }
   0x6   : > { %p186_p4 = scmp.lt.s32.totalorder (!%p157_p3), %s416_s12, 1 }
   0x7   : > { %160 = sbr.rel (%p157_p3) target bundleno = 153 (0x99), region = 32 }
   0xc   : > { %v212_v0 = vld [vmem:[%s509_s1 + $0x10] sm:$0xff]  ;;  %v210_v1 = vld [vmem:[%s509_s1] sm:$0xff]  ;;  %v426_v2 = vmov 0   ;;  %v213_v3 = vld [vmem:[%s509_s1 + $0x18] sm:$0xff]  ;;  %s517_s12 = smov (!%p186_p4, %s416_s12), 1 }
   0xd   : > { %401 = vset.pattern.permute.xlu1 %v426_v2  ;;  %400 = vset.pattern.permute.xlu0 %v426_v2  ;;  %v211_v4 = vld [vmem:[%s509_s1 + $0x8] sm:$0xff]  ;;  %v238_v6 = vld [vmem:[%s510_s2] sm:$0xff]  ;;  %v241_v7 = vld [vmem:[%s510_s2 + $0x18] sm:$0xff]  ;;  %s364_s5 = sshll.u32 %s517_s12, 4  ;;  %s365_s9 = sshll.u32 %s517_s12, 5 }
   0xe   : > { %226 = vperm.xlu1 %401, %v212_v0   ;;  %216 = vperm.xlu0 %400, %v210_v1   ;;  %v239_v5 = vld [vmem:[%s510_s2 + $0x8] sm:$0xff]  ;;  %v240_v8 = vld [vmem:[%s510_s2 + $0x10] sm:$0xff]  ;;  %s193_s8 = scalar_lea.vmem %s508_s0, %s364_s5  ;;  %s201_s16 = scalar_lea.vmem %s511_s3, %s365_s9 }
   0xf   : > { %v367_v11 = vld [vmem:[%s193_s8] sm:$0xff]   ;;  %v374_v14 = vld [vmem:[%s193_s8 + $0x8] sm:$0xff]  }
  0x10   : > { %v368_v12 = vunpack.c.l.bf16 %v367_v11  ;;  %v369_v13 = vunpack.c.h.bf16 %v367_v11  ;;  %v372_v17 = vunpack.c.l.bf16 %v374_v14  ;;  %v373_v19 = vunpack.c.h.bf16 %v374_v14 }
  0x12   : > { %231 = vperm.xlu1 %401, %v213_v3   ;;  %221 = vperm.xlu0 %400, %v211_v4  }
  0x16   : > { %249 = vperm.xlu1 %401, %v239_v5   ;;  %244 = vperm.xlu0 %400, %v238_v6  }
  0x1a   : > { %259 = vperm.xlu1 %401, %v241_v7   ;;  %254 = vperm.xlu0 %400, %v240_v8  }
  0x89   : > { %v227_v9 = vpop.permute.xlu1 %226  ;;  %v217_v10 = vpop.permute.xlu0 %216 }
  0x8a   : > { %v234_v18 = vmul.f32 %v368_v12, %v217_v10  ;;  %v236_v25 = vmul.f32 %v372_v17, %v227_v9 }
  0x8d   : > { %v232_v15 = vpop.permute.xlu1 %231  ;;  %v222_v16 = vpop.permute.xlu0 %221 }
  0x8e   : > { %v235_v20 = vmul.f32 %v369_v13, %v222_v16  ;;  %v237_v26 = vmul.f32 %v373_v19, %v232_v15 }
  0x91   : > { %v250_v21 = vpop.permute.xlu1 %249  ;;  %v245_v22 = vpop.permute.xlu0 %244 }
  0x92   : > { %v263_v23 = vadd.f32 %v250_v21, %v235_v20  ;;  %v262_v24 = vadd.f32 %v245_v22, %v234_v18 }
  0x94   : > { %267 = vst [vmem:[%s201_s16 + $0x8] sm:$0xff] %v263_v23  ;;  %266 = vst [vmem:[%s201_s16] sm:$0xff] %v262_v24 }
  0x95   : > { %v260_v27 = vpop.permute.xlu1 %259  ;;  %v255_v28 = vpop.permute.xlu0 %254 }
  0x96   : > { %v265_v29 = vadd.f32 %v260_v27, %v237_v26  ;;  %v264_v30 = vadd.f32 %v255_v28, %v236_v25 }
  0x98   : > { %269 = vst [vmem:[%s201_s16 + $0x18] sm:$0xff] %v265_v29  ;;  %268 = vst [vmem:[%s201_s16 + $0x10] sm:$0xff] %v264_v30 }
  0x99 PF: > { %s13_s14 = sadd.s32 1, %s424_s14   ;;  %s512_s12 = smov %s420_s13 }
  0x9a   : > { %p10_p5 = scmp.ge.s32.totalorder %s13_s14, 4   ;;  %s513_s13 = smov %s515_s15 }
  0x9c   :  { %12 = sbr.rel (!%p10_p5) target bundleno = 2 (0x2), region = 62 }

// kernel: patch_embed_overlapping.2
= control target key start
LH: loop header
LB: loop body
LE: loop exit
PB: predicated region body
PF: predicated region fallthrough
CT: control target
= control target key end

     0   :  { %s710_s15 = smov 0   ;;  %s712_s16 = smov 0   ;;  %s757_s0 = inlined_call_operand.vmem [shape: bf16[2,64,128], index: 0, kind: input, shape index: {}]   ;;  %s758_s1 = inlined_call_operand.vmem [shape: bf16[32,64], index: 1, kind: input, shape index: {}]   ;;  %s759_s2 = inlined_call_operand.vmem [shape: bf16[2,32,128], index: 2, kind: output, shape index: {0}]   ;;  %s760_s3 = inlined_call_operand.vmem [shape: f32[2,32,128], index: 3, kind: output, shape index: {1}]   ;;  %s761_s4 = inlined_call_operand.vmem [shape: f32[2,32,128], index: 4, kind: output, shape index: {2}]  }
   0x1   :  { %s714_s17 = smov 0  }
   0x2 LB: > { %s27_s18 = sadd.s32 1, %s679_s16  ;;  %p570_p0 = scmp.ge.s32.totalorder %s683_s17, 1  ;;  %s683_s17 = sphi %s714_s17, %s15_s17   ;;  %s679_s16 = sphi %s712_s16, %s763_s16   ;;  %s675_s15 = sphi %s710_s15, %s762_s15  }
   0x3   : > { %p29_p1 = scmp.ge.s32.totalorder %s27_s18, 2  ;;  %p186_p2 = scmp.lt.s32.totalorder %s683_s17, 3 }
   0x5   : > { %s765_s18 = smov (%p29_p1, %s27_s18), 0  ;;  %p187_p3 = pnand %p570_p0, %p186_p2 }
   0x6   : > { %p228_p4 = scmp.lt.s32.totalorder (!%p187_p3), %s675_s15, 1 }
   0x7   : > { %190 = sbr.rel (%p187_p3) target bundleno = 234 (0xea), region = 28 }
   0xc   : > { %v659_v0 = vld [vmem:[%s758_s1] sm:$0xff]   ;;  %vm301_vm0 = vcmask 523264   ;;  %s767_s15 = smov (!%p228_p4, %s675_s15), 1  ;;  %v660_v5 = vld [vmem:[%s758_s1 + $0x8] sm:$0xff]  }
   0xd   : > { %626 = vmatprep.mubr.msk.bf16.mxu0 %vm301_vm0, %v659_v0  ;;  %s593_s21 = sshll.u32 %s767_s15, 5  ;;  %s594_s30 = sshll.u32 %s767_s15, 4 }
   0xe   : > { %s235_s24 = scalar_lea.vmem %s757_s0, %s593_s21  ;;  %s248_s29 = scalar_lea.vmem %s760_s3, %s593_s21 }
   0xf   : > { %v655_v1 = vld [vmem:[%s235_s24 + $0x18] sm:$0xff]   ;;  %v656_v2 = vld [vmem:[%s235_s24 + $0x10] sm:$0xff]   ;;  %v657_v3 = vld [vmem:[%s235_s24 + $0x8] sm:$0xff]   ;;  %s253_s7 = scalar_lea.vmem %s761_s4, %s593_s21  ;;  %s243_s10 = scalar_lea.vmem %s759_s2, %s594_s30 }
  0x10   : > { %618 = vmatprep.subr.bf16.mxu0 %v655_v1  ;;  %v658_v4 = vld [vmem:[%s235_s24] sm:$0xff]  }
  0x11   : > { %619 = vmatpush3.bf16.msra.mxu0 %v655_v1 }
  0x12   : > { %620 = vmatprep.subr.bf16.mxu0 %v656_v2 }
  0x15   : > { %621 = vmatpush3.bf16.msra.mxu0 %v656_v2 }
  0x16   : > { %622 = vmatprep.subr.bf16.mxu0 %v657_v3 }
  0x19   : > { %623 = vmatpush3.bf16.msra.mxu0 %v657_v3 }
  0x1a   : > { %624 = vmatprep.subr.bf16.mxu0 %v658_v4 }
  0x1d   : > { %625 = vmatpush3.bf16.msra.mxu0 %v658_v4 }
  0x20   : > { %627 = vmatmul.mubr.msk.bf16.vlgmr.msra.gmra.mxu0 %vm301_vm0, %v660_v5 }
  0xe0   : > { %v628_v6 = vpop.f32.mrf.mxu0 }
  0xe1   : > { %v379_v7 = vmul.f32 %v628_v6, %v628_v6  ;;  %403 = vst [vmem:[%s248_s29 + $0x10] sm:$0xff] %v628_v6 }
  0xe2   : > { %v342_v8 = vpop.f32.mrf.mxu0 }
  0xe3   : > { %v377_v9 = vmul.f32 %v342_v8, %v342_v8  ;;  %415 = vst [vmem:[%s253_s7 + $0x10] sm:$0xff] %v379_v7  ;;  %401 = vst [vmem:[%s248_s29] sm:$0xff] %v342_v8 }
  0xe4   : > { %v629_v10 = vpop.f32.mrf.mxu0 }
  0xe5   : > { %v609_v11 = vpack.c.bf16 %v629_v10, %v628_v6  ;;  %v380_v12 = vmul.f32 %v629_v10, %v629_v10  ;;  %413 = vst [vmem:[%s253_s7] sm:$0xff] %v377_v9  ;;  %404 = vst [vmem:[%s248_s29 + $0x18] sm:$0xff] %v629_v10 }
  0xe6   : > { %v345_v13 = vpop.f32.mrf.mxu0 }
  0xe7   : > { %v604_v14 = vpack.c.bf16 %v345_v13, %v342_v8  ;;  %611 = vst [vmem:[%s243_s10 + $0x8] sm:$0xff] %v609_v11   ;;  %v378_v15 = vmul.f32 %v345_v13, %v345_v13  ;;  %416 = vst [vmem:[%s253_s7 + $0x18] sm:$0xff] %v380_v12 }
  0xe8   : > { %402 = vst [vmem:[%s248_s29 + $0x8] sm:$0xff] %v345_v13 }
  0xe9   : > { %605 = vst [vmem:[%s243_s10] sm:$0xff] %v604_v14   ;;  %414 = vst [vmem:[%s253_s7 + $0x8] sm:$0xff] %v378_v15 }
  0xea PF: > { %s15_s17 = sadd.s32 1, %s683_s17   ;;  %s762_s15 = smov %s679_s16 }
  0xeb   : > { %p12_p5 = scmp.ge.s32.totalorder %s15_s17, 4   ;;  %s763_s16 = smov %s765_s18 }
  0xed   :  { %14 = sbr.rel (!%p12_p5) target bundleno = 2 (0x2), region = 86 }

</bundles_post_ra>
